<compile_context>
chip_gen: v7x
topology: tpu7x:2x2x1
jax: 0.10.0
libtpu: 0.0.40
codegen_flags: <defaults>
</compile_context>

<pallas_src>
import jax
import jax.numpy as jnp
from jax import lax
from jax.experimental import pallas as pl
from jax.experimental.pallas import tpu as pltpu


def _round_up(x, m):
    return (x + m - 1) // m * m


# ----------------------------------------------------------------------------
# Pass 1: conv-as-matmul (bf16 inputs, f32 accumulation) + per-channel stats
# ----------------------------------------------------------------------------
def _conv_stats_kernel(patches_ref, w_ref, y_ref, stats_ref):
    # (TM, K) @ (K, Cpad) on the MXU, accumulate in f32.
    y = jnp.dot(patches_ref[...], w_ref[...], preferred_element_type=jnp.float32)
    y_ref[...] = y.astype(y_ref.dtype)  # bf16 intermediate: halves HBM traffic

    @pl.when(pl.program_id(0) == 0)
    def _init():
        stats_ref[...] = jnp.zeros_like(stats_ref)

    s = jnp.sum(y, axis=0, keepdims=True)        # (1, Cpad) per-channel sum
    ss = jnp.sum(y * y, axis=0, keepdims=True)   # (1, Cpad) per-channel sum-sq
    pad = jnp.zeros((stats_ref.shape[0] - 2, s.shape[1]), jnp.float32)
    stats_ref[...] += jnp.concatenate([s, ss, pad], axis=0)


# ----------------------------------------------------------------------------
# Pass 2: folded BN affine + LeakyReLU(0.2):  z = y * scale + shift
# ----------------------------------------------------------------------------
def _bn_act_kernel(y_ref, scale_ref, shift_ref, out_ref):
    z = y_ref[...].astype(jnp.float32) * scale_ref[...] + shift_ref[...]
    out_ref[...] = jnp.maximum(z, 0.2 * z)       # LeakyReLU(0.2), one VALU op


# ----------------------------------------------------------------------------
# Wrapper: im2col glue (bf16) + two pallas_calls
# ----------------------------------------------------------------------------
def encoder_block_forward(x_nchw, weight, bias, gamma, beta):
    """x_nchw: (N, Cin, H, W); weight: (Cout, Cin, 4, 4); bias/gamma/beta: (Cout,).

    The conv bias is exactly cancelled by the BatchNorm mean subtraction, so it
    is intentionally not applied (forward semantics are unchanged).
    """
    del bias  # cancels in batch-norm mean subtraction
    n, cin, h, w = x_nchw.shape
    cout, _, kh, kw = weight.shape
    stride, padd = 2, 1
    oh = (h + 2 * padd - kh) // stride + 1
    ow = (w + 2 * padd - kw) // stride + 1
    m_rows = n * oh * ow
    k_dim = cin * kh * kw

    # --- glue: im2col in bf16 NHWC ------------------------------------------
    # TODO(synk): fold the 16-tap gather into the kernel with strided in-VMEM
    # slices from a banded NHWC input block to avoid materializing the 4x
    # duplicated patch matrix in HBM.
    x_nhwc = jnp.transpose(x_nchw, (0, 2, 3, 1)).astype(jnp.bfloat16)
    x_pad = jnp.pad(x_nhwc, ((0, 0), (padd, padd), (padd, padd), (0, 0)))
    cols = []
    for i in range(kh):
        for j in range(kw):
            cols.append(
                x_pad[:, i:i + oh * stride:stride, j:j + ow * stride:stride, :])
    patches = jnp.stack(cols, axis=0)                  # (KH*KW, N, OH, OW, Cin)
    patches = jnp.transpose(patches, (1, 2, 3, 4, 0))  # (N, OH, OW, Cin, KH*KW)
    patches = patches.reshape(m_rows, k_dim)           # K order matches torch weight

    # --- tiling: lane-dense Cout, VMEM-budgeted M tile ------------------------
    c_pad = _round_up(cout, 128)                 # lane-dense output / full MXU N
    tm = min(512, _round_up(m_rows, 8))

    def _pass1_bytes(t):
        return (2 * t * k_dim * 2            # patch tile, double-buffered, bf16
                + k_dim * c_pad * 2          # resident weights, bf16
                + 2 * t * c_pad * 2          # conv tile, double-buffered, bf16
                + 8 * c_pad * 4)             # stats accumulator

    while tm > 8 and _pass1_bytes(tm) > 20 * 1024 * 1024:
        tm = _round_up(tm // 2, 8)
    m_pad = _round_up(m_rows, tm)
    num_tiles = m_pad // tm

    patches = jnp.pad(patches, ((0, m_pad - m_rows), (0, 0)))          # bf16
    w_mat = weight.reshape(cout, k_dim).T.astype(jnp.bfloat16)         # (K, Cout)
    w_mat = jnp.pad(w_mat, ((0, 0), (0, c_pad - cout)))                # (K, Cpad)

    # --- pass 1: conv matmul + per-channel sum / sum-of-squares --------------
    bytes1 = patches.size * 2 + w_mat.size * 2 + m_pad * c_pad * 2 + 8 * c_pad * 4
    y_conv, stats = pl.pallas_call(
        _conv_stats_kernel,
        grid=(num_tiles,),
        in_specs=[
            pl.BlockSpec((tm, k_dim), lambda i: (i, 0)),       # patch tile
            pl.BlockSpec((k_dim, c_pad), lambda i: (0, 0)),    # weights, resident
        ],
        out_specs=[
            pl.BlockSpec((tm, c_pad), lambda i: (i, 0)),       # conv output tile
            pl.BlockSpec((8, c_pad), lambda i: (0, 0)),        # stats accumulator
        ],
        out_shape=[
            jax.ShapeDtypeStruct((m_pad, c_pad), jnp.bfloat16),
            jax.ShapeDtypeStruct((8, c_pad), jnp.float32),
        ],
        compiler_params=pltpu.CompilerParams(
            dimension_semantics=("arbitrary",),
            vmem_limit_bytes=32 * 1024 * 1024),
        cost_estimate=pl.CostEstimate(
            flops=2 * m_pad * k_dim * c_pad,
            transcendentals=0,
            bytes_accessed=bytes1),
    )(patches, w_mat)

    # --- tiny glue: fold BN into one per-channel scale/shift (f32) -----------
    # Zero-padded rows contribute 0 to both sums (no bias added), so divide by
    # the true M.
    inv_m = 1.0 / float(m_rows)
    mean = stats[0:1, :] * inv_m                                   # (1, Cpad)
    var = jnp.maximum(stats[1:2, :] * inv_m - mean * mean, 0.0)    # (1, Cpad)
    g_row = jnp.pad(gamma.astype(jnp.float32).reshape(1, cout),
                    ((0, 0), (0, c_pad - cout)))
    b_row = jnp.pad(beta.astype(jnp.float32).reshape(1, cout),
                    ((0, 0), (0, c_pad - cout)))
    scale = g_row * lax.rsqrt(var + 1e-5)                          # (1, Cpad)
    shift = b_row - mean * scale                                   # (1, Cpad)

    # --- pass 2: larger M tiles (amortize per-step overhead), megacore --------
    grp = 1
    while (num_tiles % (grp * 2) == 0 and grp < 8
           and (grp * 2) * tm * c_pad * 12 <= 16 * 1024 * 1024):
        grp *= 2
    tm2 = tm * grp
    num_tiles2 = m_pad // tm2

    bytes2 = m_pad * c_pad * 2 + m_pad * c_pad * 4 + 2 * c_pad * 4
    out_2d = pl.pallas_call(
        _bn_act_kernel,
        grid=(num_tiles2,),
        in_specs=[
            pl.BlockSpec((tm2, c_pad), lambda i: (i, 0)),
            pl.BlockSpec((1, c_pad), lambda i: (0, 0)),
            pl.BlockSpec((1, c_pad), lambda i: (0, 0)),
        ],
        out_specs=pl.BlockSpec((tm2, c_pad), lambda i: (i, 0)),
        out_shape=jax.ShapeDtypeStruct((m_pad, c_pad), jnp.float32),
        compiler_params=pltpu.CompilerParams(
            dimension_semantics=("parallel",),
            vmem_limit_bytes=32 * 1024 * 1024),
        cost_estimate=pl.CostEstimate(
            flops=3 * m_pad * c_pad,
            transcendentals=0,
            bytes_accessed=bytes2),
    )(y_conv, scale, shift)

    # (Mpad, Cpad) -> slice real rows/channels -> (N, OH, OW, Cout) -> NCHW
    out = out_2d[:m_rows, :cout].reshape(n, oh, ow, cout)
    return jnp.transpose(out, (0, 3, 1, 2))


# ----------------------------------------------------------------------------
# Pure-JAX reference (same semantics, f32, includes the bias) for a silent check
# ----------------------------------------------------------------------------
def _reference(x_nchw, weight, bias, gamma, beta):
    y = lax.conv_general_dilated(
        x_nchw.astype(jnp.float32), weight.astype(jnp.float32),
        window_strides=(2, 2), padding=((1, 1), (1, 1)),
        dimension_numbers=("NCHW", "OIHW", "NCHW"))
    y = y + bias.reshape(1, -1, 1, 1)
    mean = jnp.mean(y, axis=(0, 2, 3), keepdims=True)
    var = jnp.mean((y - mean) ** 2, axis=(0, 2, 3), keepdims=True)
    xhat = (y - mean) * lax.rsqrt(var + 1e-5)
    z = gamma.reshape(1, -1, 1, 1) * xhat + beta.reshape(1, -1, 1, 1)
    return jnp.where(z >= 0.0, z, 0.2 * z)


if __name__ == "__main__":
    key = jax.random.PRNGKey(0)
    k_x, k_w, k_b = jax.random.split(key, 3)

    N, CIN, H, W = 2, 4, 16, 16
    COUT = 8

    x = jax.random.normal(k_x, (N, CIN, H, W), dtype=jnp.float32)
    weight = 0.1 * jax.random.normal(k_w, (COUT, CIN, 4, 4), dtype=jnp.float32)
    bias = 0.05 * jax.random.normal(k_b, (COUT,), dtype=jnp.float32)
    gamma = jnp.ones((COUT,), dtype=jnp.float32)   # BatchNorm2d weight init
    beta = jnp.zeros((COUT,), dtype=jnp.float32)   # BatchNorm2d bias init

    out = encoder_block_forward(x, weight, bias, gamma, beta)
    out = jax.block_until_ready(out)

    ref = _reference(x, weight, bias, gamma, beta)
    assert out.shape == (N, COUT, H // 2, W // 2)
    # bf16 MXU inputs / bf16 intermediate (f32 accumulation & stats) -> slightly
    # looser tolerance vs the f32 reference.
    assert jnp.allclose(out, ref, atol=5e-2, rtol=5e-2)

    print("KERNEL_OK")
</pallas_src>

<mosaic_0001>
module attributes {stable_mosaic.version = 11 : i64} {
  func.func @_conv_stats_kernel(%arg0: i32, %arg1: memref<128x64xbf16, #tpu.memory_space<vmem>>, %arg2: memref<64x128xbf16, #tpu.memory_space<vmem>>, %arg3: memref<128x128xbf16, #tpu.memory_space<vmem>>, %arg4: memref<8x128xf32, #tpu.memory_space<vmem>>) attributes {dimension_semantics = [#tpu.dimension_semantics<arbitrary>], iteration_bounds = array<i64: 1>, scalar_prefetch = 0 : i64, scratch_operands = 0 : i64, tpu.core_type = #tpu.core_type<tc>, window_params = [{transform_indices = @transform_0, window_bounds = array<i64: 128, 64>}, {pipeline_mode = #tpu.pipeline_mode<synchronous>, transform_indices = @transform_1, window_bounds = array<i64: 64, 128>}, {transform_indices = @transform_2, window_bounds = array<i64: 128, 128>}, {pipeline_mode = #tpu.pipeline_mode<synchronous>, transform_indices = @transform_3, window_bounds = array<i64: 8, 128>}]} {
    %c0 = arith.constant 0 : index
    %c0_0 = arith.constant 0 : index
    %0 = vector.load %arg1[%c0, %c0_0] : memref<128x64xbf16, #tpu.memory_space<vmem>>, vector<128x64xbf16>
    %c0_1 = arith.constant 0 : index
    %c0_2 = arith.constant 0 : index
    %1 = vector.load %arg2[%c0_1, %c0_2] : memref<64x128xbf16, #tpu.memory_space<vmem>>, vector<64x128xbf16>
    %cst = arith.constant dense<0.000000e+00> : vector<128x128xf32>
    %2 = tpu.matmul %0, %1, %cst {dimension_numbers = #tpu.dot_dimension_numbers<[1], [0], [0], [1], [0, 0, 1, 1], [], []>} : vector<128x64xbf16>, vector<64x128xbf16>, vector<128x128xf32> -> vector<128x128xf32>
    %3 = arith.truncf %2 : vector<128x128xf32> to vector<128x128xbf16>
    %c0_3 = arith.constant 0 : index
    %c0_4 = arith.constant 0 : index
    %4 = vector.load %arg3[%c0_3, %c0_4] : memref<128x128xbf16, #tpu.memory_space<vmem>>, vector<128x128xbf16>
    tpu.vector_store %arg3[%c0_3, %c0_4], %3 {strides = array<i32>} : memref<128x128xbf16, #tpu.memory_space<vmem>>, vector<128x128xbf16>,
    %c0_i32 = arith.constant 0 : i32
    %5 = arith.cmpi eq, %arg0, %c0_i32 : i32
    %6 = arith.extui %5 : i1 to i32
    %c0_i32_5 = arith.constant 0 : i32
    %7 = arith.cmpi ne, %6, %c0_i32_5 : i32
    scf.if %7 {
      %cst_13 = arith.constant 0.000000e+00 : f32
      %18 = vector.broadcast %cst_13 : f32 to vector<8x128xf32>
      %c0_14 = arith.constant 0 : index
      %c0_15 = arith.constant 0 : index
      %19 = vector.load %arg4[%c0_14, %c0_15] : memref<8x128xf32, #tpu.memory_space<vmem>>, vector<8x128xf32>
      tpu.vector_store %arg4[%c0_14, %c0_15], %18 {strides = array<i32>} : memref<8x128xf32, #tpu.memory_space<vmem>>, vector<8x128xf32>,
    } else {
    }
    %cst_6 = arith.constant dense<0.000000e+00> : vector<128xf32>
    %8 = vector.multi_reduction <add>, %2, %cst_6 [0] : vector<128x128xf32> to vector<128xf32>
    %9 = vector.shape_cast %8 : vector<128xf32> to vector<1x128xf32>
    %10 = arith.mulf %2, %2 : vector<128x128xf32>
    %cst_7 = arith.constant dense<0.000000e+00> : vector<128xf32>
    %11 = vector.multi_reduction <add>, %10, %cst_7 [0] : vector<128x128xf32> to vector<128xf32>
    %12 = vector.shape_cast %11 : vector<128xf32> to vector<1x128xf32>
    %cst_8 = arith.constant 0.000000e+00 : f32
    %13 = vector.broadcast %cst_8 : f32 to vector<6x128xf32>
    %c0_9 = arith.constant 0 : index
    %c0_10 = arith.constant 0 : index
    %14 = vector.load %arg4[%c0_9, %c0_10] : memref<8x128xf32, #tpu.memory_space<vmem>>, vector<8x128xf32>
    %15 = tpu.concatenate %9, %12, %13 in 0 : vector<1x128xf32>, vector<1x128xf32>, vector<6x128xf32> -> vector<8x128xf32>
    %16 = arith.addf %14, %15 : vector<8x128xf32>
    %c0_11 = arith.constant 0 : index
    %c0_12 = arith.constant 0 : index
    %17 = vector.load %arg4[%c0_11, %c0_12] : memref<8x128xf32, #tpu.memory_space<vmem>>, vector<8x128xf32>
    tpu.vector_store %arg4[%c0_11, %c0_12], %16 {strides = array<i32>} : memref<8x128xf32, #tpu.memory_space<vmem>>, vector<8x128xf32>,
    return
  }
  func.func @transform_0(%arg0: i32) -> (i32, i32) {
    %c0_i32 = arith.constant 0 : i32
    %c0_i32_0 = arith.constant 0 : i32
    return %arg0, %c0_i32 : i32, i32
  }
  func.func @transform_1(%arg0: i32) -> (i32, i32) {
    %c0_i32 = arith.constant 0 : i32
    %c0_i32_0 = arith.constant 0 : i32
    %c0_i32_1 = arith.constant 0 : i32
    return %c0_i32, %c0_i32_0 : i32, i32
  }
  func.func @transform_2(%arg0: i32) -> (i32, i32) {
    %c0_i32 = arith.constant 0 : i32
    %c0_i32_0 = arith.constant 0 : i32
    return %arg0, %c0_i32 : i32, i32
  }
  func.func @transform_3(%arg0: i32) -> (i32, i32) {
    %c0_i32 = arith.constant 0 : i32
    %c0_i32_0 = arith.constant 0 : i32
    %c0_i32_1 = arith.constant 0 : i32
    return %c0_i32, %c0_i32_0 : i32, i32
  }
}

</mosaic_0001>

<bundles_post_ra>
// kernel: tpu_custom_call.1
= control target key start
LH: loop header
LB: loop body
LE: loop exit
PB: predicated region body
PF: predicated region fallthrough
CT: control target
= control target key end

     0   :  { %9 = vsyncpa [#allocation3], 0  ;;  %vm104_vm0 = vcmask 523264   ;;  %s736_s0 = inlined_call_operand.vmem [shape: bf16[128,64], index: 0, kind: input, shape index: {}]   ;;  %s737_s1 = inlined_call_operand.vmem [shape: bf16[64,128], index: 1, kind: input, shape index: {}]   ;;  %s738_s2 = inlined_call_operand.hbm [shape: bf16[128,128], index: 2, kind: output, shape index: {0}]   ;;  %s739_s3 = inlined_call_operand.hbm [shape: f32[8,128], index: 3, kind: output, shape index: {1}]  }
   0x1   :  { %v554_v0 = vld [vmem:[%s737_s1] sm:$0xff]   ;;  %v555_v1 = vld [vmem:[%s737_s1 + $0x8] sm:$0xff]   ;;  %v556_v2 = vld [vmem:[%s737_s1 + $0x10] sm:$0xff]  }
   0x2   :  { %517 = vmatprep.subr.bf16.mxu0 %v554_v0  ;;  %541 = vmatprep.subr.bf16.mxu1 %v554_v0  ;;  %v558_v3 = vld [vmem:[%s736_s0] sm:$0xff]   ;;  %v557_v4 = vld [vmem:[%s737_s1 + $0x18] sm:$0xff]  }
   0x3   :  { %518 = vmatpush3.bf16.msra.mxu0 %v554_v0  ;;  %545 = vmatpush3.bf16.msra.mxu1 %v554_v0  ;;  %v562_v5 = vld [vmem:[%s736_s0 + $0x20] sm:$0xff]  }
   0x4   :  { %519 = vmatprep.subr.bf16.mxu0 %v555_v1  ;;  %542 = vmatprep.subr.bf16.mxu1 %v555_v1 }
   0x5   :  { %525 = vmatprep.mubr.msk.bf16.mxu0 %vm104_vm0, %v558_v3  ;;  %533 = vmatprep.mubr.msk.bf16.mxu1 %vm104_vm0, %v562_v5 }
   0x7   :  { %520 = vmatpush3.bf16.msra.mxu0 %v555_v1  ;;  %546 = vmatpush3.bf16.msra.mxu1 %v555_v1 }
   0x8   :  { %521 = vmatprep.subr.bf16.mxu0 %v556_v2  ;;  %543 = vmatprep.subr.bf16.mxu1 %v556_v2 }
   0xb   :  { %522 = vmatpush3.bf16.msra.mxu0 %v556_v2  ;;  %547 = vmatpush3.bf16.msra.mxu1 %v556_v2 }
   0xc   :  { %523 = vmatprep.subr.bf16.mxu0 %v557_v4  ;;  %544 = vmatprep.subr.bf16.mxu1 %v557_v4 }
   0xd   :  { %10 = vsyncpa [#allocation5], 0  ;;  %v559_v6 = vld [vmem:[%s736_s0 + $0x8] sm:$0xff]   ;;  %v560_v8 = vld [vmem:[%s736_s0 + $0x10] sm:$0xff]  }
   0xe   :  { %v563_v7 = vld [vmem:[%s736_s0 + $0x28] sm:$0xff]   ;;  %v564_v9 = vld [vmem:[%s736_s0 + $0x30] sm:$0xff]   ;;  %v561_v10 = vld [vmem:[%s736_s0 + $0x18] sm:$0xff]  }
   0xf   :  { %524 = vmatpush3.bf16.msra.mxu0 %v557_v4  ;;  %548 = vmatpush3.bf16.msra.mxu1 %v557_v4  ;;  %v565_v11 = vld [vmem:[%s736_s0 + $0x38] sm:$0xff]   ;;  %s614_s0 = smov [#allocation2]  }
  0x10   :  { %s381_s8 = sshll.u32 %s614_s0, 4  ;;  %s382_s8 = int_to_ptr.vmem [resolvable:$true] %s381_s8 }
  0x11   :  { %s566_s9 = scalar_lea.vmem %s382_s8, 1024  ;;  %p571_p1 = scmp.lt.s32.totalorder %s382_s8, %s382_s8 }
  0x12   :  { %526 = vmatmul.mubr.msk.bf16.vlgmr.msra.gmra.mrb[0].mxu0 %vm104_vm0, %v559_v6  ;;  %534 = vmatmul.mubr.msk.bf16.vlgmr.msra.gmra.mrb[0].mxu1 %vm104_vm0, %v563_v7  ;;  %p567_p0 = scmp.ne.s32.totalorder %s382_s8, %s566_s9  ;;  %p572_p2 = scmp.lt.s32.totalorder %s566_s9, %s566_s9 }
  0x13   :  { %529 = vmatprep.mubr.msk.bf16.mxu0 %vm104_vm0, %v560_v8  ;;  %537 = vmatprep.mubr.msk.bf16.mxu1 %vm104_vm0, %v564_v9 }
  0x14   :  { %p573_p3 = por %p572_p2, %p571_p1 }
  0x16   :  { %p574_p4 = pnand %p573_p3, %p567_p0 }
  0x1a   :  { %530 = vmatmul.mubr.msk.bf16.gmra.mrb[4].mxu0 %vm104_vm0, %v561_v10  ;;  %538 = vmatmul.mubr.msk.bf16.gmra.mrb[4].mxu1 %vm104_vm0, %v565_v11 }
  0xe5   :  { %v527_v12 = vpop.f32.mrb[0].mxu0  ;;  %v682_v13 = vpop.f32.mrb[0].mxu1 }
  0xe6   :  { %v163_v14 = vpop.f32.mrb[1].mxu0  ;;  %v684_v15 = vpop.f32.mrb[1].mxu1  ;;  %v334_v27 = vmul.f32 %v527_v12, %v527_v12 }
  0xe7   :  { %v528_v16 = vpop.f32.mrb[2].mxu0  ;;  %v686_v17 = vpop.f32.mrb[2].mxu1  ;;  %v332_v18 = vmul.f32 %v163_v14, %v163_v14  ;;  %v340_v57 = vmul.f32 %v684_v15, %v684_v15 }
  0xe8   :  { %v466_v19 = vpack.c.bf16 %v528_v16, %v527_v12  ;;  %v166_v20 = vpop.f32.mrb[3].mxu0  ;;  %v486_v21 = vpack.c.bf16 %v686_v17, %v682_v13  ;;  %v690_v22 = vpop.f32.mrb[3].mxu1  ;;  %v335_v30 = vmul.f32 %v528_v16, %v528_v16 }
  0xe9   :  { %v461_v23 = vpack.c.bf16 %v166_v20, %v163_v14  ;;  %v311_v24 = vadd.f32 %v166_v20, %v163_v14  ;;  %v333_v25 = vmul.f32 %v166_v20, %v166_v20  ;;  %v481_v26 = vpack.c.bf16 %v690_v22, %v684_v15 }
  0xea   :  { %498 = vst [vmem:[#allocation2 + $0x8] sm:$0xff] %v466_v19   ;;  %502 = vst [vmem:[#allocation2 + $0x28] sm:$0xff] %v486_v21  }
  0xeb   :  { %462 = vst [vmem:[#allocation2] sm:$0xff] %v461_v23   ;;  %v312_v28 = vadd.f32 %v527_v12, %v311_v24  ;;  %v348_v29 = vadd.f32 %v333_v25, %v332_v18  ;;  %501 = vst [vmem:[#allocation2 + $0x20] sm:$0xff] %v481_v26  }
  0xed   :  { %v349_v31 = vadd.f32 %v348_v29, %v334_v27  ;;  %v531_v32 = vpop.f32.mrb[4].mxu0  ;;  %v313_v33 = vadd.f32 %v528_v16, %v312_v28  ;;  %v694_v34 = vpop.f32.mrb[4].mxu1 }
  0xee   :  { %v179_v35 = vpop.f32.mrb[5].mxu0  ;;  %v211_v36 = vpop.f32.mrb[5].mxu1  ;;  %v338_v51 = vmul.f32 %v531_v32, %v531_v32 }
  0xef   :  { %v314_v37 = vadd.f32 %v313_v33, %v179_v35  ;;  %v336_v38 = vmul.f32 %v179_v35, %v179_v35  ;;  %v350_v39 = vadd.f32 %v349_v31, %v335_v30  ;;  %v532_v40 = vpop.f32.mrb[6].mxu0  ;;  %v540_v41 = vpop.f32.mrb[6].mxu1 }
  0xf0   :  { %v476_v42 = vpack.c.bf16 %v532_v40, %v531_v32  ;;  %v182_v43 = vpop.f32.mrb[7].mxu0  ;;  %v496_v44 = vpack.c.bf16 %v540_v41, %v694_v34  ;;  %v214_v45 = vpop.f32.mrb[7].mxu1  ;;  %v339_v54 = vmul.f32 %v532_v40, %v532_v40 }
  0xf1   :  { %v351_v46 = vadd.f32 %v350_v39, %v336_v38  ;;  %v471_v47 = vpack.c.bf16 %v182_v43, %v179_v35  ;;  %v315_v48 = vadd.f32 %v314_v37, %v182_v43  ;;  %v337_v49 = vmul.f32 %v182_v43, %v182_v43 }
  0xf2   :  { %500 = vst [vmem:[#allocation2 + $0x18] sm:$0xff] %v476_v42   ;;  %504 = vst [vmem:[#allocation2 + $0x38] sm:$0xff] %v496_v44   ;;  %v491_v50 = vpack.c.bf16 %v214_v45, %v211_v36 }
  0xf3   :  { %499 = vst [vmem:[#allocation2 + $0x10] sm:$0xff] %v471_v47   ;;  %v316_v52 = vadd.f32 %v531_v32, %v315_v48  ;;  %v352_v53 = vadd.f32 %v351_v46, %v337_v49 }
  0xf4   :  { %503 = vst [vmem:[#allocation2 + $0x30] sm:$0xff] %v491_v50  }
  0xf5   :  { %v353_v55 = vadd.f32 %v352_v53, %v338_v51  ;;  %v317_v56 = vadd.f32 %v532_v40, %v316_v52 }
  0xf6   :  { %577 = shalt.err (!%p574_p4)
}
  0xf7   :  { %s578_s12 = scalar_lea.hbm %s738_s2, 1024 }
  0xf8   :  { %p579_p5 = scmp.ne.s32.totalorder %s738_s2, %s578_s12  ;;  %p582_p6 = scmp.lt.u32.totalorder %s578_s12, %s738_s2 }
  0xfa   :  { %p584_p7 = pnand %p582_p6, %p579_p5 }
  0xfc   :  { %587 = shalt.err (!%p584_p7)
}
  0xfd   :  { %s615_s17 = smov 64   ;;  %s616_s18 = smov 4   ;;  %v318_v58 = vadd.f32 %v317_v56, %v684_v15  ;;  %v354_v59 = vadd.f32 %v353_v55, %v339_v54  ;;  %v341_v62 = vmul.f32 %v690_v22, %v690_v22  ;;  %v342_v63 = vmul.f32 %v682_v13, %v682_v13 }
  0xfe   :  { %387 = dma.vmem_to_hbm [thread:$0]  %s382_s8, 1024, %s738_s2, [#allocation3], %s615_s17, %s615_s17, %s616_s18   ;;  %v343_v2 = vmul.f32 %v686_v17, %v686_v17  ;;  %v344_v5 = vmul.f32 %v211_v36, %v211_v36  ;;  %v345_v10 = vmul.f32 %v214_v45, %v214_v45  ;;  %v346_v11 = vmul.f32 %v694_v34, %v694_v34 }
  0xff   :  { %v355_v60 = vadd.f32 %v354_v59, %v340_v57  ;;  %v319_v61 = vadd.f32 %v318_v58, %v690_v22  ;;  %vm370_vm1 = vcmask 1040384   ;;  %vm372_vm2 = vcmask 1041408   ;;  %s617_s2 = smov [#allocation4]  }
 0x100   :  { %s394_s21 = sshll.u32 %s617_s2, 4  ;;  %s395_s21 = int_to_ptr.vmem [resolvable:$true] %s394_s21 }
 0x101   :  { %v320_v0 = vadd.f32 %v682_v13, %v319_v61  ;;  %v356_v1 = vadd.f32 %v355_v60, %v341_v62  ;;  %v347_v13 = vmul.f32 %v540_v41, %v540_v41  ;;  %s588_s22 = scalar_lea.vmem %s395_s21, 128  ;;  %p593_p9 = scmp.lt.s32.totalorder %s395_s21, %s395_s21 }
 0x102   :  { %p589_p8 = scmp.ne.s32.totalorder %s395_s21, %s588_s22  ;;  %p594_p10 = scmp.lt.s32.totalorder %s588_s22, %s588_s22 }
 0x103   :  { %v357_v3 = vadd.f32 %v356_v1, %v342_v63  ;;  %v321_v4 = vadd.f32 %v686_v17, %v320_v0 }
 0x104   :  { %p595_p11 = por %p594_p10, %p593_p9 }
 0x105   :  { %v322_v6 = vadd.f32 %v321_v4, %v211_v36  ;;  %v358_v7 = vadd.f32 %v357_v3, %v343_v2 }
 0x106   :  { %p596_p12 = pnand %p595_p11, %p589_p8 }
 0x107   :  { %v359_v8 = vadd.f32 %v358_v7, %v344_v5  ;;  %v323_v9 = vadd.f32 %v322_v6, %v214_v45 }
 0x109   :  { %v324_v12 = vadd.f32 %v694_v34, %v323_v9  ;;  %v360_v14 = vadd.f32 %v359_v8, %v345_v10 }
 0x10b   :  { %v325_v15 = vadd.f32 %v540_v41, %v324_v12  ;;  %v361_v16 = vadd.f32 %v360_v14, %v346_v11 }
 0x10d   :  { %v326_v18 = vrot.slane %v325_v15, 4  ;;  %v362_v19 = vadd.f32 %v361_v16, %v347_v13 }
 0x10f   :  { %v327_v20 = vadd.f32 %v326_v18, %v325_v15  ;;  %v363_v21 = vrot.slane %v362_v19, 4 }
 0x111   :  { %v328_v17 = vrot.slane %v327_v20, 2  ;;  %v364_v22 = vadd.f32 %v363_v21, %v362_v19 }
 0x113   :  { %v329_v23 = vadd.f32 %v328_v17, %v327_v20  ;;  %v365_v24 = vrot.slane %v364_v22, 2 }
 0x115   :  { %v330_v25 = vrot.slane %v329_v23, 1  ;;  %v366_v26 = vadd.f32 %v365_v24, %v364_v22 }
 0x117   :  { %v367_v27 = vrot.slane %v366_v26, 1  ;;  %v331_v28 = vadd.f32 %v330_v25, %v329_v23 }
 0x119   :  { %v368_v29 = vadd.f32 %v367_v27, %v366_v26 }
 0x11b   :  { %v371_v30 = vsel %vm370_vm1, %v331_v28, %v368_v29 }
 0x11c   :  { %v373_v31 = vsel %vm372_vm2, %v371_v30, 0.0 }
 0x11d   :  { %375 = vst [vmem:[#allocation4] sm:$0xff] %v373_v31 }
 0x11e   :  { %599 = shalt.err (!%p596_p12)
}
 0x11f   :  { %s600_s25 = scalar_lea.hbm %s739_s3, 128 }
 0x120   :  { %p601_p13 = scmp.ne.s32.totalorder %s739_s3, %s600_s25  ;;  %p604_p0 = scmp.lt.u32.totalorder %s600_s25, %s739_s3 }
 0x122   :  { %p606_p1 = pnand %p604_p0, %p601_p13 }
 0x124   :  { %609 = shalt.err (!%p606_p1)
}
 0x125   :  { %397 = dma.vmem_to_hbm [thread:$0]  %s395_s21, 128, %s739_s3, [#allocation5]  }
 0x126   :  { %610 = dma.done.wait [#allocation3], 1024  }
 0x127   :  { %611 = vsyncadd [#allocation3], 4294966272 }
 0x128   :  { %612 = dma.done.wait [#allocation5], 128  }
 0x129   :  { %613 = vsyncadd [#allocation5], 4294967168 }
 0x12a   :  { %404 = vsyncpa [#allocation3], 1 }
 0x12b   :  { %405 = vsyncpa [#allocation5], 1 }

</bundles_post_ra>
